<compile_context>
chip_gen: v6e
topology: v6e:2x2x1
jax: 0.10.0
libtpu: 0.0.40
codegen_flags: <defaults>
</compile_context>

<pallas_src>
import jax
import jax.numpy as jnp
from jax.experimental import pallas as pl
from jax.experimental.pallas import tpu as pltpu  # noqa: F401  (TPU backend module)

# ----------------------------- model dimensions -----------------------------
B, S, H = 2, 8, 768        # batch, sequence length, config.hidden_size
C = 4                      # config.num_temporal_classes
M = B * S                  # flattened matmul M dimension (16)
LAMBD = 0.1                # config.lambd (gradient-reversal strength; backward only)


# ------------------- gradient reversal (forward == identity) ----------------
@jax.custom_vjp
def grad_reverse(x, lambd):
    return x                                   # GradientReversalFn.forward: x.view_as(x)


def _gr_fwd(x, lambd):
    return x, lambd


def _gr_bwd(lambd, g):
    # GradientReversalFn.backward: grad * -lambd; zero cotangent for lambd so
    # jax.grad through this function has a well-formed pytree.
    return (-lambd * g, jnp.zeros_like(lambd))


grad_reverse.defvjp(_gr_fwd, _gr_bwd)


# ---------------------- Pallas kernel: decoder linear -----------------------
def _decoder_kernel(x_ref, w_ref, b_ref, out_ref):
    # x_ref:   (M, H)   bf16 flattened sequence output
    # w_ref:   (H, C)   bf16 decoder weight, [in, out]
    # b_ref:   (1, C)   f32 decoder bias
    # out_ref: (M, C)   f32 logits
    out_ref[...] = (
        jnp.dot(x_ref[...], w_ref[...], preferred_element_type=jnp.float32)
        + b_ref[...]
    )


def temporal_prediction_head(sequence_output, w_bf16, b_f32, lambd):
    """Forward of TemporalPredictionHead: grad-reverse (identity) -> Linear(H, C)."""
    x = grad_reverse(sequence_output, lambd)
    x2d = x.reshape(M, H).astype(jnp.bfloat16)          # bf16 MXU operand, f32 acc

    out = pl.pallas_call(
        _decoder_kernel,
        # no grid: single block, single pipeline stage, no per-step overhead
        in_specs=[
            pl.BlockSpec((M, H), lambda: (0, 0)),        # (16, 768): 8/128-aligned
            pl.BlockSpec((H, C), lambda: (0, 0)),        # (768, 4): C == full last dim
            pl.BlockSpec((1, C), lambda: (0, 0)),
        ],
        out_specs=pl.BlockSpec((M, C), lambda: (0, 0)),
        out_shape=jax.ShapeDtypeStruct((M, C), jnp.float32),
    )(x2d, w_bf16, b_f32)

    return out.reshape(B, S, C)


temporal_prediction_head_jit = jax.jit(temporal_prediction_head)


# --------------------------------- parameters -------------------------------
def init_params(key):
    kw, kb = jax.random.split(key)
    # stored [in, out] so the kernel computes x @ W + b directly on the MXU
    w = 0.02 * jax.random.normal(kw, (H, C), dtype=jnp.float32)
    b = 0.02 * jax.random.normal(kb, (C,), dtype=jnp.float32)
    w_bf16 = w.astype(jnp.bfloat16)              # bf16 matmul operand (half HBM bytes)
    b_f32 = b.reshape(1, C)                      # bias stays f32 (added to f32 acc)
    return w, b, w_bf16, b_f32


# ------------------------------------ main -----------------------------------
if __name__ == "__main__":
    key = jax.random.PRNGKey(0)
    pkey, dkey = jax.random.split(key)

    w, b, w_bf16, b_f32 = init_params(pkey)
    sequence_output = jax.random.normal(dkey, (B, S, H), dtype=jnp.float32)
    lambd = jnp.float32(LAMBD)

    out = temporal_prediction_head_jit(sequence_output, w_bf16, b_f32, lambd)
    jax.block_until_ready(out)

    # pure-JAX f32 reference: gradient reversal is identity in the forward pass.
    # Tolerance relaxed because the kernel runs bf16-in / f32-accumulate.
    ref = sequence_output @ w + b
    assert out.shape == (B, S, C)
    assert jnp.allclose(out, ref, atol=2e-2, rtol=2e-2)
    print("KERNEL_OK")
</pallas_src>

<mosaic_0001>
module attributes {stable_mosaic.version = 11 : i64} {
  func.func @_decoder_kernel(%arg0: memref<16x768xbf16, #tpu.memory_space<vmem>>, %arg1: memref<768x4xbf16, #tpu.memory_space<vmem>>, %arg2: memref<1x4xf32, #tpu.memory_space<vmem>>, %arg3: memref<16x4xf32, #tpu.memory_space<vmem>>) attributes {dimension_semantics = [], scalar_prefetch = 0 : i64, scratch_operands = 0 : i64, tpu.core_type = #tpu.core_type<tc>} {
    %c0 = arith.constant 0 : index
    %c0_0 = arith.constant 0 : index
    %0 = vector.load %arg0[%c0, %c0_0] : memref<16x768xbf16, #tpu.memory_space<vmem>>, vector<16x768xbf16>
    %c0_1 = arith.constant 0 : index
    %c0_2 = arith.constant 0 : index
    %1 = vector.load %arg1[%c0_1, %c0_2] : memref<768x4xbf16, #tpu.memory_space<vmem>>, vector<768x4xbf16>
    %cst = arith.constant dense<0.000000e+00> : vector<16x4xf32>
    %2 = tpu.matmul %0, %1, %cst {dimension_numbers = #tpu.dot_dimension_numbers<[1], [0], [0], [1], [0, 0, 1, 1], [], []>} : vector<16x768xbf16>, vector<768x4xbf16>, vector<16x4xf32> -> vector<16x4xf32>
    %c0_3 = arith.constant 0 : index
    %c0_4 = arith.constant 0 : index
    %3 = vector.load %arg2[%c0_3, %c0_4] : memref<1x4xf32, #tpu.memory_space<vmem>>, vector<1x4xf32>
    %4 = vector.broadcast %3 : vector<1x4xf32> to vector<16x4xf32>
    %5 = arith.addf %2, %4 : vector<16x4xf32>
    %c0_5 = arith.constant 0 : index
    %c0_6 = arith.constant 0 : index
    %6 = vector.load %arg3[%c0_5, %c0_6] : memref<16x4xf32, #tpu.memory_space<vmem>>, vector<16x4xf32>
    tpu.vector_store %arg3[%c0_5, %c0_6], %5 {strides = array<i32>} : memref<16x4xf32, #tpu.memory_space<vmem>>, vector<16x4xf32>,
    return
  }
}

</mosaic_0001>

<bundles_post_ra>
// kernel: temporal_prediction_head.1
= control target key start
LH: loop header
LB: loop body
LE: loop exit
PB: predicated region body
PF: predicated region fallthrough
CT: control target
= control target key end

     0   :  { %vm565_vm0 = vcmask 31744   ;;  %s941_s1 = inlined_call_operand.vmem [shape: bf16[768,4], index: 1, kind: input, shape index: {}]   ;;  %s942_s0 = inlined_call_operand.vmem [shape: bf16[16,768], index: 0, kind: input, shape index: {}]   ;;  %s943_s2 = inlined_call_operand.vmem [shape: f32[1,4], index: 2, kind: input, shape index: {}]   ;;  %s944_s3 = inlined_call_operand.vmem [shape: f32[16,4], index: 3, kind: output, shape index: {}]  }
   0x1   :  { %v693_v0 = vld [vmem:[%s941_s1 + $0x78] sm:$0xff]   ;;  %v697_v4 = vld [vmem:[%s941_s1 + $0x70] sm:$0xff]   ;;  %v701_v8 = vld [vmem:[%s941_s1 + $0x68] sm:$0xff]  }
   0x2   :  { %v694_v1 = vld [vmem:[%s941_s1 + $0x38] sm:$0xff]   ;;  %627 = vmatprep.subr.bf16.mxu0 %v693_v0  ;;  %v698_v5 = vld [vmem:[%s941_s1 + $0x30] sm:$0xff]   ;;  %v702_v9 = vld [vmem:[%s941_s1 + $0x28] sm:$0xff]  }
   0x3   :  { %v695_v2 = vld [vmem:[%s941_s1 + $0xf8] sm:$0xff]   ;;  %628 = vmatpush3.bf16.msra.mxu0 %v694_v1  ;;  %v699_v6 = vld [vmem:[%s941_s1 + $0xf0] sm:$0xff]   ;;  %v703_v10 = vld [vmem:[%s941_s1 + $0xe8] sm:$0xff]  }
   0x4   :  { %v696_v3 = vld [vmem:[%s941_s1 + $0xb8] sm:$0xff]   ;;  %649 = vmatprep.subr.bf16.mxu1 %v695_v2  ;;  %629 = vmatprep.subr.bf16.mxu0 %v697_v4  ;;  %v700_v7 = vld [vmem:[%s941_s1 + $0xb0] sm:$0xff]   ;;  %v704_v11 = vld [vmem:[%s941_s1 + $0xa8] sm:$0xff]  }
   0x5   :  { %650 = vmatpush3.bf16.msra.mxu1 %v696_v3  ;;  %v705_v12 = vld [vmem:[%s941_s1 + $0x60] sm:$0xff]   ;;  %v709_v16 = vld [vmem:[%s941_s1 + $0x58] sm:$0xff]   ;;  %v713_v20 = vld [vmem:[%s941_s1 + $0x50] sm:$0xff]  }
   0x6   :  { %651 = vmatprep.subr.bf16.mxu1 %v699_v6  ;;  %v706_v13 = vld [vmem:[%s941_s1 + $0x20] sm:$0xff]   ;;  %v710_v17 = vld [vmem:[%s941_s1 + $0x18] sm:$0xff]   ;;  %v714_v21 = vld [vmem:[%s941_s1 + $0x10] sm:$0xff]  }
   0x7   :  { %630 = vmatpush3.bf16.msra.mxu0 %v698_v5  ;;  %v707_v14 = vld [vmem:[%s941_s1 + $0xe0] sm:$0xff]   ;;  %v711_v18 = vld [vmem:[%s941_s1 + $0xd8] sm:$0xff]   ;;  %v715_v22 = vld [vmem:[%s941_s1 + $0xd0] sm:$0xff]  }
   0x8   :  { %631 = vmatprep.subr.bf16.mxu0 %v701_v8  ;;  %v708_v15 = vld [vmem:[%s941_s1 + $0xa0] sm:$0xff]   ;;  %v712_v19 = vld [vmem:[%s941_s1 + $0x98] sm:$0xff]   ;;  %v716_v23 = vld [vmem:[%s941_s1 + $0x90] sm:$0xff]  }
   0x9   :  { %652 = vmatpush3.bf16.msra.mxu1 %v700_v7  ;;  %v717_v24 = vld [vmem:[%s941_s1 + $0x48] sm:$0xff]   ;;  %v721_v28 = vld [vmem:[%s941_s1 + $0x40] sm:$0xff]   ;;  %v728_v34 = vld [vmem:[%s941_s1 + $0x178] sm:$0xff]  }
   0xa   :  { %653 = vmatprep.subr.bf16.mxu1 %v703_v10  ;;  %v718_v25 = vld [vmem:[%s941_s1 + $0x8] sm:$0xff]   ;;  %v722_v29 = vld [vmem:[%s941_s1] sm:$0xff]   ;;  %v732_v37 = vld [vmem:[%s941_s1 + $0x138] sm:$0xff]  }
   0xb   :  { %632 = vmatpush3.bf16.msra.mxu0 %v702_v9  ;;  %v719_v26 = vld [vmem:[%s941_s1 + $0xc8] sm:$0xff]   ;;  %v723_v30 = vld [vmem:[%s941_s1 + $0xc0] sm:$0xff]   ;;  %v733_v38 = vld [vmem:[%s941_s1 + $0x170] sm:$0xff]  }
   0xc   :  { %633 = vmatprep.subr.bf16.mxu0 %v705_v12  ;;  %v720_v27 = vld [vmem:[%s941_s1 + $0x88] sm:$0xff]   ;;  %v724_v31 = vld [vmem:[%s942_s0] ss:$24 sps:$4 sm:$0xff]   ;;  %v726_v32 = vld [vmem:[%s942_s0 + $0x4] ss:$24 sps:$4 sm:$0xff]  }
   0xd   :  { %654 = vmatpush3.bf16.msra.mxu1 %v704_v11  ;;  %v727_v33 = vld [vmem:[%s941_s1 + $0x80] sm:$0xff]   ;;  %474 = vmatprep.mubr.bf16.mxu0 %v726_v32  ;;  %v734_v39 = vld [vmem:[%s941_s1 + $0x130] sm:$0xff]   ;;  %v735_v40 = vld [vmem:[%s941_s1 + $0x168] sm:$0xff]  }
   0xe   :  { %655 = vmatprep.subr.bf16.mxu1 %v707_v14  ;;  %v729_v35 = vld [vmem:[%s942_s0 + $0x8] ss:$24 sps:$4 sm:$0xff]   ;;  %v731_v36 = vld [vmem:[%s942_s0 + $0xc] ss:$24 sps:$4 sm:$0xff]   ;;  %v739_v44 = vld [vmem:[%s941_s1 + $0x158] sm:$0xff]  }
   0xf   :  { %634 = vmatpush3.bf16.msra.mxu0 %v706_v13  ;;  %515 = vmatprep.mubr.bf16.mxu1 %v731_v36  ;;  %v736_v41 = vld [vmem:[%s941_s1 + $0x128] sm:$0xff]   ;;  %v737_v42 = vld [vmem:[%s941_s1 + $0x160] sm:$0xff]   ;;  %v740_v45 = vld [vmem:[%s941_s1 + $0x118] sm:$0xff]  }
  0x10   :  { %635 = vmatprep.subr.bf16.mxu0 %v709_v16  ;;  %v738_v43 = vld [vmem:[%s941_s1 + $0x120] sm:$0xff]   ;;  %v741_v46 = vld [vmem:[%s941_s1 + $0x150] sm:$0xff]   ;;  %v743_v49 = vld [vmem:[%s941_s1 + $0x148] sm:$0xff]  }
  0x11   :  { %656 = vmatpush3.bf16.msra.mxu1 %v708_v15  ;;  %v749_v47 = vld [vmem:[%s942_s0 + $0x14] ss:$24 sps:$4 sm:$0xff]   ;;  %v745_v51 = vld [vmem:[%s941_s1 + $0x140] sm:$0xff]   ;;  %v747_v53 = vld [vmem:[%s942_s0 + $0x10] ss:$24 sps:$4 sm:$0xff]  }
  0x12   :  { %657 = vmatprep.subr.bf16.mxu1 %v711_v18  ;;  %v742_v48 = vld [vmem:[%s941_s1 + $0x110] sm:$0xff]   ;;  %v744_v50 = vld [vmem:[%s941_s1 + $0x108] sm:$0xff]   ;;  %v746_v52 = vld [vmem:[%s941_s1 + $0x100] sm:$0xff]  }
  0x13   :  { %636 = vmatpush3.bf16.msra.mxu0 %v710_v17  ;;  %v572_v60 = vld [vmem:[%s943_s2] ss:$0 sm:$0xff] }
  0x14   :  { %637 = vmatprep.subr.bf16.mxu0 %v713_v20 }
  0x15   :  { %658 = vmatpush3.bf16.msra.mxu1 %v712_v19 }
  0x16   :  { %659 = vmatprep.subr.bf16.mxu1 %v715_v22 }
  0x17   :  { %638 = vmatpush3.bf16.msra.mxu0 %v714_v21 }
  0x18   :  { %639 = vmatprep.subr.bf16.mxu0 %v717_v24 }
  0x19   :  { %660 = vmatpush3.bf16.msra.mxu1 %v716_v23 }
  0x1a   :  { %661 = vmatprep.subr.bf16.mxu1 %v719_v26 }
  0x1b   :  { %640 = vmatpush3.bf16.msra.mxu0 %v718_v25 }
  0x1c   :  { %641 = vmatprep.subr.bf16.mxu0 %v721_v28 }
  0x1d   :  { %662 = vmatpush3.bf16.msra.mxu1 %v720_v27 }
  0x1e   :  { %663 = vmatprep.subr.bf16.mxu1 %v723_v30 }
  0x1f   :  { %642 = vmatpush3.bf16.msra.mxu0 %v722_v29 }
  0x20   :  { %671 = vmatprep.subr.bf16.mxu0 %v728_v34 }
  0x21   :  { %664 = vmatpush3.bf16.msra.mxu1 %v727_v33 }
  0x22   :  { %475 = vmatmul.mubr.bf16.vlgmr.msra.gmra.mxu0 %v724_v31 }
  0x23   :  { %672 = vmatpush3.bf16.msra.mxu0 %v732_v37  ;;  %556 = vmatprep.mubr.bf16.mxu0 %v749_v47 }
  0x24   :  { %516 = vmatmul.mubr.bf16.vlgmr.msra.gmra.mxu1 %v729_v35  ;;  %673 = vmatprep.subr.bf16.mxu0 %v733_v38 }
  0x27   :  { %674 = vmatpush3.bf16.msra.mxu0 %v734_v39 }
  0x28   :  { %675 = vmatprep.subr.bf16.mxu0 %v735_v40 }
  0x2b   :  { %676 = vmatpush3.bf16.msra.mxu0 %v736_v41 }
  0x2c   :  { %677 = vmatprep.subr.bf16.mxu0 %v737_v42 }
  0x2f   :  { %678 = vmatpush3.bf16.msra.mxu0 %v738_v43 }
  0x30   :  { %679 = vmatprep.subr.bf16.mxu0 %v739_v44 }
  0x33   :  { %680 = vmatpush3.bf16.msra.mxu0 %v740_v45 }
  0x34   :  { %681 = vmatprep.subr.bf16.mxu0 %v741_v46 }
  0x37   :  { %682 = vmatpush3.bf16.msra.mxu0 %v742_v48 }
  0x38   :  { %683 = vmatprep.subr.bf16.mxu0 %v743_v49 }
  0x3b   :  { %684 = vmatpush3.bf16.msra.mxu0 %v744_v50 }
  0x3c   :  { %685 = vmatprep.subr.bf16.mxu0 %v745_v51 }
  0x3f   :  { %686 = vmatpush3.bf16.msra.mxu0 %v746_v52 }
  0x42   :  { %557 = vmatmul.mubr.bf16.vlgmr.msra.gmra.mxu0 %v747_v53 }
  0xe2   :  { %v643_v54 = vpop.f32.mrf.mxu0 }
  0xe4   :  { %v644_v55 = vpop.f32.mrf.mxu0  ;;  %v665_v56 = vpop.f32.mrf.mxu1 }
  0xe5   :  { %v645_v59 = vadd.f32 %v644_v55, %v643_v54 }
  0xe6   :  { %v646_v57 = vpop.f32.mrf.mxu0  ;;  %v666_v58 = vpop.f32.mrf.mxu1 }
  0xe7   :  { %v477_v63 = vadd.f32 %v645_v59, %v572_v60  ;;  %v667_v0 = vadd.f32 %v666_v58, %v665_v56 }
  0xe8   :  { %v647_v61 = vpop.f32.mrf.mxu0  ;;  %v668_v62 = vpop.f32.mrf.mxu1 }
  0xe9   :  { %v648_v1 = vadd.f32 %v647_v61, %v646_v57  ;;  %v518_v5 = vadd.f32 %v667_v0, %v477_v63 }
  0xea   :  { %v669_v2 = vpop.f32.mrf.mxu1 }
  0xeb   :  { %v480_v6 = vadd.f32 %v648_v1, %v572_v60  ;;  %v670_v7 = vadd.f32 %v669_v2, %v668_v62 }
  0xed   :  { %v521_v12 = vadd.f32 %v670_v7, %v480_v6 }
 0x102   :  { %v687_v3 = vpop.f32.mrf.mxu0 }
 0x104   :  { %v688_v4 = vpop.f32.mrf.mxu0 }
 0x105   :  { %v689_v8 = vadd.f32 %v688_v4, %v687_v3 }
 0x106   :  { %v690_v9 = vpop.f32.mrf.mxu0 }
 0x107   :  { %v559_v10 = vadd.f32 %v689_v8, %v518_v5 }
 0x108   :  { %v691_v11 = vpop.f32.mrf.mxu0 }
 0x109   :  { %566 = vst.msk [vmem:[%s944_s3] sm:$0xff] %vm565_vm0, %v559_v10  ;;  %v692_v13 = vadd.f32 %v691_v11, %v690_v9 }
 0x10b   :  { %v562_v14 = vadd.f32 %v692_v13, %v521_v12 }
 0x10d   :  { %567 = vst.msk [vmem:[%s944_s3 + $0x8] sm:$0xff] %vm565_vm0, %v562_v14 }

</bundles_post_ra>
